<compile_context>
chip_gen: v6e
topology: v6e:2x2x1
jax: 0.10.0
libtpu: 0.0.40
codegen_flags: <defaults>
</compile_context>

<pallas_src>
import jax
import jax.numpy as jnp
from jax.experimental import pallas as pl
from jax.experimental.pallas import tpu as pltpu


def _patch_recovery_kernel(x_ref, w_ref, b_ref, o_ref):
    # x_ref: (TILE_R, W*C)        one tile of pixel-rows (streamed)
    # w_ref: (W*C, p*W*p*O)       interleave-baked block-diagonal weight (resident)
    # b_ref: (1, p*W*p*O)         broadcast bias (resident)
    # o_ref: (TILE_R, p*W*p*O)    output rows already in final layout (lane-dense)
    y = jnp.dot(x_ref[...], w_ref[...], preferred_element_type=jnp.float32)
    o_ref[...] = (y + b_ref[...]).astype(o_ref.dtype)


def _choose_tile_r(rows, cap):
    """Pick a sublane-aligned row tile.

    Prefers the largest divisor of `rows` (no padding -> no output-slice copy)
    that is a multiple of 8 and keeps >= 2 grid steps (both v7x TensorCores).
    Returns (tile_r, needs_pad).
    """
    cap = max(1, min(cap, rows))
    if rows >= 16:
        cap = min(cap, rows // 2)          # keep grid >= 2
    best = 1
    for t in range(cap, 0, -1):
        if rows % t == 0:
            if t % 8 == 0:
                return t, False
            if best == 1:
                best = t
    if best >= 8 or rows <= 8:
        return best, False
    # No usable divisor: pad rows up to a multiple of an 8-aligned tile.
    return max(8, cap - cap % 8), True


def patch_recovery_forward(x, w, b, patch_size, *, tile_r=1024):
    """Forward pass of PatchRecovery.

    x: (B, T, H, W, C) float32
    w: (C, O, p, p)  ConvTranspose2d weight in PyTorch (in, out, kH, kW) layout
    b: (O,)          ConvTranspose2d bias
    Returns (B, T, H*p, W*p, O) float32.
    """
    B, T, H, W, C = x.shape
    p = patch_size
    O = w.shape[1]

    R = B * T * H                 # kernel rows: one per (b, t, h)
    Kf = W * C                    # folded contraction dim (a whole pixel-row)
    Nf = p * W * p * O            # folded output dim in final (ph, w, pw, o) order

    # ---- parameter relayout (tiny, one-time) ----
    # w: (C, O, ph, pw) -> (C, ph, pw, O)
    w_perm = jnp.transpose(w, (0, 2, 3, 1)).astype(jnp.float32)
    # Wbig[w*C + c, ((ph*W + w')*p + pw)*O + o] = w_perm[c, ph, pw, o] * (w == w')
    # This bakes the (h,ph)/(w,pw) interleave of the final layout into the matmul.
    w_big = jnp.einsum("xw,cijo->xciwjo", jnp.eye(W, dtype=jnp.float32), w_perm)
    w_big = w_big.reshape(Kf, Nf)
    b_row = jnp.broadcast_to(
        b.reshape(1, 1, 1, O).astype(jnp.float32), (p, W, p, O)
    ).reshape(1, Nf)

    # ---- input fold: (B,T,H,W,C) -> (R, W*C) is a free row-major reshape ----
    x2d = x.reshape(R, Kf).astype(jnp.float32)

    # ---- tiling over rows (HBM-bound: big tiles; grid >= 2 for v7x megacore) ----
    tile, needs_pad = _choose_tile_r(R, tile_r)
    grid_r = pl.cdiv(R, tile)
    R_pad = grid_r * tile
    if R_pad != R:
        # TODO(synk): ragged-row fallback costs one extra output-slice copy.
        x2d = jnp.pad(x2d, ((0, R_pad - R), (0, 0)))

    # VMEM budget derived from actual tile sizes (double-buffered in/out/weight).
    vmem_bytes = 4 * (2 * tile * Kf + 2 * tile * Nf + 2 * Kf * Nf + 2 * Nf)
    vmem_limit = int(min(max(vmem_bytes + (1 << 20), 8 << 20), 64 << 20))

    cost = pl.CostEstimate(
        flops=2 * (B * T * H * W) * C * (p * p * O),   # useful flops only
        transcendentals=0,
        bytes_accessed=4 * (R * Kf + Kf * Nf + Nf + R * Nf),
    )

    out2d = pl.pallas_call(
        _patch_recovery_kernel,
        out_shape=jax.ShapeDtypeStruct((R_pad, Nf), jnp.float32),
        grid_spec=pltpu.PrefetchScalarGridSpec(
            num_scalar_prefetch=0,
            grid=(grid_r,),
            in_specs=[
                pl.BlockSpec((tile, Kf), lambda i: (i, 0)),   # streamed rows
                pl.BlockSpec((Kf, Nf), lambda i: (0, 0)),     # resident weight
                pl.BlockSpec((1, Nf), lambda i: (0, 0)),      # resident bias
            ],
            out_specs=pl.BlockSpec((tile, Nf), lambda i: (i, 0)),
        ),
        compiler_params=pltpu.CompilerParams(
            dimension_semantics=("parallel",),                # 2 TCs on v7x
            vmem_limit_bytes=vmem_limit,
        ),
        cost_estimate=cost,
    )(x2d, w_big, b_row)

    if R_pad != R:
        out2d = out2d[:R]
    # (R, p*W*p*O) is already the final row-major layout -> free reshape.
    return out2d.reshape(B, T, H * p, W * p, O)


def _reference(x, w, b, patch_size):
    """Pure-JAX reference for stride==kernel ConvTranspose2d (independent patches)."""
    B, T, H, W, C = x.shape
    p = patch_size
    O = w.shape[1]
    y = jnp.einsum("bthwc,coij->bthiwjo", x, w)
    y = y.reshape(B, T, H * p, W * p, O) + b.reshape(1, 1, 1, 1, O)
    return y


if __name__ == "__main__":
    # Small shapes consistent with PatchRecovery(patch_size=4, dim=8, output_dim=2)
    B, T, H, W = 2, 2, 16, 16
    patch_size, dim, output_dim = 4, 8, 2

    key = jax.random.PRNGKey(0)
    kx, kw, kb = jax.random.split(key, 3)

    x = jax.random.normal(kx, (B, T, H, W, dim), dtype=jnp.float32)

    # nn.ConvTranspose2d init: weight (in, out, kH, kW), uniform(+-1/sqrt(fan_in))
    fan_in = dim * patch_size * patch_size
    bound = 1.0 / (fan_in ** 0.5)
    w = jax.random.uniform(kw, (dim, output_dim, patch_size, patch_size),
                           jnp.float32, -bound, bound)
    b = jax.random.uniform(kb, (output_dim,), jnp.float32, -bound, bound)

    out = patch_recovery_forward(x, w, b, patch_size)
    out = jax.block_until_ready(out)

    ref = _reference(x, w, b, patch_size)
    assert out.shape == (B, T, H * patch_size, W * patch_size, output_dim), out.shape
    assert jnp.allclose(out, ref, atol=1e-4, rtol=1e-4), "mismatch vs reference"

    print("KERNEL_OK")
</pallas_src>

<mosaic_0001>
module attributes {stable_mosaic.version = 11 : i64} {
  func.func @_patch_recovery_kernel(%arg0: i32, %arg1: memref<32x128xf32, #tpu.memory_space<vmem>>, %arg2: memref<128x512xf32, #tpu.memory_space<vmem>>, %arg3: memref<1x512xf32, #tpu.memory_space<vmem>>, %arg4: memref<32x512xf32, #tpu.memory_space<vmem>>) attributes {dimension_semantics = [#tpu.dimension_semantics<parallel>], iteration_bounds = array<i64: 2>, scalar_prefetch = 0 : i64, scratch_operands = 0 : i64, tpu.core_type = #tpu.core_type<tc>, window_params = [{transform_indices = @transform_0, window_bounds = array<i64: 32, 128>}, {pipeline_mode = #tpu.pipeline_mode<synchronous>, transform_indices = @transform_1, window_bounds = array<i64: 128, 512>}, {pipeline_mode = #tpu.pipeline_mode<synchronous>, transform_indices = @transform_2, window_bounds = array<i64: 1, 512>}, {transform_indices = @transform_3, window_bounds = array<i64: 32, 512>}]} {
    %c0 = arith.constant 0 : index
    %c0_0 = arith.constant 0 : index
    %0 = vector.load %arg1[%c0, %c0_0] : memref<32x128xf32, #tpu.memory_space<vmem>>, vector<32x128xf32>
    %c0_1 = arith.constant 0 : index
    %c0_2 = arith.constant 0 : index
    %1 = vector.load %arg2[%c0_1, %c0_2] : memref<128x512xf32, #tpu.memory_space<vmem>>, vector<128x512xf32>
    %cst = arith.constant dense<0.000000e+00> : vector<32x512xf32>
    %2 = tpu.matmul %0, %1, %cst {dimension_numbers = #tpu.dot_dimension_numbers<[1], [0], [0], [1], [0, 0, 1, 1], [], []>} : vector<32x128xf32>, vector<128x512xf32>, vector<32x512xf32> -> vector<32x512xf32>
    %c0_3 = arith.constant 0 : index
    %c0_4 = arith.constant 0 : index
    %3 = vector.load %arg3[%c0_3, %c0_4] : memref<1x512xf32, #tpu.memory_space<vmem>>, vector<1x512xf32>
    %4 = vector.broadcast %3 : vector<1x512xf32> to vector<32x512xf32>
    %5 = arith.addf %2, %4 : vector<32x512xf32>
    %c0_5 = arith.constant 0 : index
    %c0_6 = arith.constant 0 : index
    %6 = vector.load %arg4[%c0_5, %c0_6] : memref<32x512xf32, #tpu.memory_space<vmem>>, vector<32x512xf32>
    tpu.vector_store %arg4[%c0_5, %c0_6], %5 {strides = array<i32>} : memref<32x512xf32, #tpu.memory_space<vmem>>, vector<32x512xf32>,
    return
  }
  func.func @transform_0(%arg0: i32) -> (i32, i32) {
    %c0_i32 = arith.constant 0 : i32
    %c0_i32_0 = arith.constant 0 : i32
    return %arg0, %c0_i32 : i32, i32
  }
  func.func @transform_1(%arg0: i32) -> (i32, i32) {
    %c0_i32 = arith.constant 0 : i32
    %c0_i32_0 = arith.constant 0 : i32
    %c0_i32_1 = arith.constant 0 : i32
    return %c0_i32, %c0_i32_0 : i32, i32
  }
  func.func @transform_2(%arg0: i32) -> (i32, i32) {
    %c0_i32 = arith.constant 0 : i32
    %c0_i32_0 = arith.constant 0 : i32
    %c0_i32_1 = arith.constant 0 : i32
    return %c0_i32, %c0_i32_0 : i32, i32
  }
  func.func @transform_3(%arg0: i32) -> (i32, i32) {
    %c0_i32 = arith.constant 0 : i32
    %c0_i32_0 = arith.constant 0 : i32
    return %arg0, %c0_i32 : i32, i32
  }
}

</mosaic_0001>

<bundles_post_ra>
// kernel: tpu_custom_call.1
= control target key start
LH: loop header
LB: loop body
LE: loop exit
PB: predicated region body
PF: predicated region fallthrough
CT: control target
= control target key end

     0   :  { %8 = vsyncpa [#allocation3], 0  ;;  %s1108_s0 = inlined_call_operand.hbm [shape: f32[64,128], index: 0, kind: input, shape index: {}]   ;;  %s1109_s1 = inlined_call_operand.hbm [shape: f32[128,512], index: 1, kind: input, shape index: {}]   ;;  %s1110_s2 = inlined_call_operand.hbm [shape: f32[1,512], index: 2, kind: input, shape index: {}]   ;;  %s1111_s3 = inlined_call_operand.hbm [shape: f32[64,512], index: 3, kind: output, shape index: {}]  }
   0x1   :  { %10 = vsyncpa [#allocation3 + $0x1], 0 }
   0x2   :  { %11 = vsyncpa [#allocation6], 0 }
   0x3   :  { %12 = vsyncpa [#allocation4], 0 }
   0x4   :  { %14 = vsyncpa [#allocation4 + $0x1], 0  ;;  %s886_s12 = smov 0   ;;  %s888_s13 = smov 0  }
   0x5   :  { %s890_s14 = smov 0   ;;  %s892_s15 = smov 0  }
   0x6 LB: > { %s907_s16 = sadd.s32 4294967295, %s853_s15   ;;  %s609_s17 = sadd.s32 4294967294, %s853_s15   ;;  %s853_s15 = sphi %s892_s15, %s1133_s15   ;;  %s849_s14 = sphi %s890_s14, %s1132_s14   ;;  %s845_s13 = sphi %s888_s13, %s1131_s13   ;;  %s841_s12 = sphi %s886_s12, %s1130_s12  }
   0x7   : > { %p40_p0 = scmp.ne.s32.totalorder %s845_s13, %s841_s12  ;;  %p1112_p1 = scmp.eq.s32.totalorder %s907_s16, 0 }
   0x8   : > { %p112_p3 = scmp.eq.s32.totalorder %s609_s17, 1  ;;  %p610_p5 = scmp.ge.s32.totalorder %s853_s15, 1 }
   0x9   : > { %p916_p4 = por %p1112_p1, %p40_p0  ;;  %p119_p7 = scmp.lt.s32.totalorder %s853_s15, 3 }
   0xa   : > { %p921_p6 = por %p112_p3, %p40_p0  ;;  %s855_s21 = smov [#allocation5]  }
   0xb   : > { %s1116_s18 = scalar_select %p916_p4, 1, 0 }
   0xc   : > { %s1117_s19 = scalar_select %p921_p6, 1, 0 }
   0xd   : > { %p926_p8 = pnand %p610_p5, %p119_p7  ;;  %s131_s22 = sshll.u32 %s855_s21, 4  ;;  %s132_s22 = int_to_ptr.vmem [resolvable:$true] %s131_s22 }
   0xe   : > { %s856_s24 = smov [#allocation7]   ;;  %s716_s26 = scalar_lea.vmem %s132_s22, 8192 }
   0xf   : > { %s1118_s20 = scalar_select %p926_p8, 1, 0 }
  0x10   : > { %p643_p9 = pneg %p926_p8  ;;  %s145_s25 = sshll.u32 %s856_s24, 4  ;;  %s146_s25 = int_to_ptr.vmem [resolvable:$true] %s145_s25 }
  0x11   : > { %p717_p13 = scmp.ne.s32.totalorder %s132_s22, %s716_s26  ;;  %p724_p5 = scmp.lt.s32.totalorder %s132_s22, %s132_s22 }
  0x12   : > { %p935_p11 = pnand %p643_p9, %p1112_p1  ;;  %p725_p7 = scmp.lt.s32.totalorder %s716_s26, %s716_s26 }
  0x14   : > { %p707_p12 = pneg %p935_p11  ;;  %p726_p10 = por %p725_p7, %p724_p5 }
  0x16   : > { %p719_p0 = pnand %p717_p13, %p707_p12 }
  0x18   : > { %p720_p3 = pneg %p719_p0 }
  0x1a   : > { %p727_p9 = pnand %p726_p10, %p720_p3 }
  0x1c   : > { %730 = shalt.err (!%p727_p9)
}
  0x1d   : > { %s857_s27 = smov 512   ;;  %s858_s28 = smov 32  }
  0x1e   : > { %646 = dma.hbm_to_vmem [thread:$0]  (!%p935_p11), %s1109_s1, 8192, %s132_s22, [#allocation6], %s857_s27, %s857_s27, %s858_s28  }
  0x1f   : > { %s742_s4 = scalar_lea.vmem %s146_s25, 64  ;;  %p750_p2 = scmp.lt.s32.totalorder %s146_s25, %s146_s25 }
  0x20   : > { %p743_p1 = scmp.ne.s32.totalorder %s146_s25, %s742_s4  ;;  %p751_p6 = scmp.lt.s32.totalorder %s742_s4, %s742_s4 }
  0x22   : > { %p745_p13 = pnand %p743_p1, %p707_p12  ;;  %p752_p5 = por %p751_p6, %p750_p2 }
  0x24   : > { %p746_p0 = pneg %p745_p13 }
  0x26   : > { %p753_p10 = pnand %p752_p5, %p746_p0 }
  0x28   : > { %756 = shalt.err (!%p753_p10)
}
  0x29   : > { %649 = dma.hbm_to_vmem [thread:$0]  (!%p935_p11), %s1110_s2, 64, %s146_s25, [#allocation6]  }
  0x2a   : > { %s958_s7 = sadd.s32 1, %s853_s15   ;;  %s27_s8 = sadd.s32 1, %s849_s14 }
  0x2b   : > { %s24_s9 = ssub.s32 %s853_s15, %s958_s7  ;;  %p34_p1 = scmp.ne.s32.totalorder %s849_s14, %s845_s13 }
  0x2c   : > { %p25_p2 = scmp.eq.s32.totalorder %s24_s9, 0  ;;  %p35_p6 = scmp.eq.s32.totalorder %s853_s15, 0 }
  0x2d   : > { %p1120_p12 = scmp.eq.s32.totalorder %s907_s16, 1  ;;  %p660_p7 = scmp.lt.s32.totalorder %s853_s15, 2 }
  0x2e   : > { %s974_s11 = scalar_select %p25_p2, %s849_s14, %s27_s8  }
  0x2f   : > { %p968_p3 = por %p1120_p12, %p34_p1  ;;  %p36_p9 = por %p35_p6, %p34_p1 }
  0x30   : > { %s156_s17 = sand.u32 1, %s849_s14   ;;  %s628_s22 = sshll.u32 %s853_s15, 9 }
  0x31   : > { %s1121_s10 = scalar_select %p968_p3, 1, 0 }
  0x32   : > { %s614_s21 = sshll.u32 %s156_s17, 5  ;;  %s981_s25 = scalar_lea.hbm %s1108_s0, %s628_s22 }
  0x33   : > { %s160_s26 = scalar_lea.vmem [#allocation2], %s614_s21  ;;  %p985_p11 = pnand %p660_p7, %p36_p9 }
  0x34   : > { %s167_s27 = sshll.u32 %s160_s26, 4  ;;  %s989_s29 = scalar_lea.sflag [#allocation3], %s156_s17  ;;  %s983_s27 = int_to_ptr.vmem [resolvable:$true] %s167_s27 }
  0x35   : > { %s757_s30 = scalar_lea.hbm %s981_s25, 512  ;;  %p759_p0 = pneg %p985_p11 }
  0x36   : > { %p758_p13 = scmp.ne.s32.totalorder %s981_s25, %s757_s30  ;;  %s762_s6 = scalar_lea.hbm %s1108_s0, 1024 }
  0x37   : > { %p763_p1 = scmp.lt.s32.totalorder %s981_s25, %s1108_s0  ;;  %p764_p2 = scmp.lt.s32.totalorder %s762_s6, %s757_s30 }
  0x38   : > { %p760_p5 = pnand %p759_p0, %p758_p13 }
  0x39   : > { %p765_p6 = por %p764_p2, %p763_p1 }
  0x3a   : > { %p761_p10 = pneg %p760_p5 }
  0x3c   : > { %p766_p12 = pnand %p765_p6, %p761_p10 }
  0x3e   : > { %769 = shalt.err (!%p766_p12)
}
  0x3f   : > { %s770_s17 = scalar_lea.vmem %s983_s27, 512  ;;  %s859_s21 = smov [#allocation2]  }
  0x40   : > { %p771_p7 = scmp.ne.s32.totalorder %s983_s27, %s770_s17  ;;  %s775_s22 = sshll.u32 %s859_s21, 4  ;;  %s776_s22 = int_to_ptr.vmem [resolvable:$false] %s775_s22 }
  0x41   : > { %s777_s23 = scalar_lea.vmem %s776_s22, 1024  ;;  %p778_p5 = scmp.lt.s32.totalorder %s983_s27, %s776_s22 }
  0x42   : > { %p773_p9 = pnand %p771_p7, %p759_p0  ;;  %p779_p3 = scmp.lt.s32.totalorder %s777_s23, %s770_s17 }
  0x44   : > { %p774_p13 = pneg %p773_p9  ;;  %p780_p4 = por %p779_p3, %p778_p5 }
  0x46   : > { %p781_p8 = pnand %p780_p4, %p774_p13 }
  0x48   : > { %784 = shalt.err (!%p781_p8)
}
  0x49   : > { %s860_s24 = smov 128   ;;  %s861_s26 = smov 8  }
  0x4a   : > { %653 = dma.hbm_to_vmem [thread:$0]  (!%p985_p11), %s981_s25, 512, %s983_s27, %s989_s29, %s860_s24, %s860_s24, %s861_s26  }
  0x4b   : > { %p1123_p0 = scmp.ne.s32.totalorder %s1118_s20, 0 }
  0x4c   : > { %s1013_s30 = sand.u32 (!%p1123_p0), 1, %s845_s13   ;;  %p1124_p4 = scmp.ne.s32.totalorder (!%p1123_p0), %s1116_s18, 0 }
  0x4d   : > { %179 = sbr.rel (%p1123_p0) target bundleno = 343 (0x157), region = 32  ;;  %s618_s4 = sshll.u32 (!%p1123_p0), %s1013_s30, 5 }
  0x4e   : > { %s182_s5 = scalar_lea.sflag (!%p1123_p0), [#allocation3], %s1013_s30  ;;  %s1017_s6 = scalar_lea.vmem (!%p1123_p0), [#allocation2], %s618_s4 }
  0x52   : > { %828 = dma.done.wait (%p1124_p4), %s182_s5, 512  }
  0x53   : > { %830 = vsyncadd (%p1124_p4), %s182_s5, 4294966784  ;;  %p1125_p8 = scmp.eq.s32.totalorder %s907_s16, 0 }
  0x55   : > { %832 = dma.done.wait (%p1125_p8), [#allocation6], 8256   ;;  %p1126_p3 = pmov %p1125_p8 }
  0x56   : > { %v862_v0 = vmov 0.0   ;;  %v283_v1 = vld [vmem:[#allocation5 + $0x1e8] sm:$0xff]  ;;  %v285_v2 = vld [vmem:[#allocation5 + $0x1f8] sm:$0xff]  ;;  %v282_v3 = vld [vmem:[#allocation5 + $0x1e0] sm:$0xff]  ;;  %s621_s18 = sshll.u32 %s1013_s30, 7  ;;  %s630_s25 = sshll.u32 %s907_s16, 11 }
  0x57   : > { %834 = vsyncadd (%p1126_p3), [#allocation6], 4294959040  ;;  %372 = vmatprep.mubr.f32.mxu0 %v862_v0  ;;  %461 = vmatprep.mubr.f32.mxu1 %v862_v0  ;;  %v284_v4 = vld [vmem:[#allocation5 + $0x1f0] sm:$0xff]  ;;  %v279_v5 = vld [vmem:[#allocation5 + $0x1c8] sm:$0xff]  ;;  %s1040_s20 = scalar_lea.vmem [#allocation8], %s621_s18  ;;  %s1059_s8 = scalar_lea.hbm %s1111_s3, %s630_s25 }
  0x58   : > { %308 = vmatprep.subr.mxu0 %v283_v1  ;;  %397 = vmatprep.subr.mxu1 %v285_v2  ;;  %v281_v6 = vld [vmem:[#allocation5 + $0x1d8] sm:$0xff]  ;;  %v278_v7 = vld [vmem:[#allocation5 + $0x1c0] sm:$0xff]  ;;  %v280_v8 = vld [vmem:[#allocation5 + $0x1d0] sm:$0xff]  ;;  %s517_s27 = sshll.u32 %s1040_s20, 4  ;;  %s503_s16 = scalar_lea.sflag [#allocation4], %s1013_s30  ;;  %s1061_s27 = int_to_ptr.vmem [resolvable:$true] %s517_s27 }
  0x59   : > { %309 = vmatpush1.msra.mxu0 %v282_v3  ;;  %398 = vmatpush1.msra.mxu1 %v284_v4  ;;  %v275_v9 = vld [vmem:[#allocation5 + $0x1a8] sm:$0xff]  ;;  %v277_v10 = vld [vmem:[#allocation5 + $0x1b8] sm:$0xff]  ;;  %v274_v11 = vld [vmem:[#allocation5 + $0x1a0] sm:$0xff]  ;;  %s785_s9 = scalar_lea.vmem %s1061_s27, 2048  ;;  %p1127_p10 = scmp.ne.s32.totalorder %s1121_s10, 0 }
  0x5a   : > { %310 = vmatprep.subr.mxu0 %v279_v5  ;;  %399 = vmatprep.subr.mxu1 %v281_v6  ;;  %v276_v12 = vld [vmem:[#allocation5 + $0x1b0] sm:$0xff]  ;;  %v271_v13 = vld [vmem:[#allocation5 + $0x188] sm:$0xff]  ;;  %v273_v14 = vld [vmem:[#allocation5 + $0x198] sm:$0xff]  ;;  %v288_v6 = vlaneseq  ;;  %p786_p11 = scmp.ne.s32.totalorder %s1061_s27, %s785_s9  ;;  %s863_s17 = smov [#allocation8]  }
  0x5b   : > { %311 = vmatpush1.msra.mxu0 %v278_v7  ;;  %400 = vmatpush1.msra.mxu1 %v280_v8  ;;  %v270_v15 = vld [vmem:[#allocation5 + $0x180] sm:$0xff]  ;;  %v272_v16 = vld [vmem:[#allocation5 + $0x190] sm:$0xff]  ;;  %v267_v17 = vld [vmem:[#allocation5 + $0x168] sm:$0xff]  ;;  %s789_s21 = sshll.u32 %s863_s17, 4  ;;  %s790_s21 = int_to_ptr.vmem [resolvable:$false] %s789_s21 }
  0x5c   : > { %312 = vmatprep.subr.mxu0 %v275_v9  ;;  %401 = vmatprep.subr.mxu1 %v277_v10  ;;  %v269_v18 = vld [vmem:[#allocation5 + $0x178] sm:$0xff]  ;;  %v266_v19 = vld [vmem:[#allocation5 + $0x160] sm:$0xff]  ;;  %v268_v20 = vld [vmem:[#allocation5 + $0x170] sm:$0xff]  ;;  %v289_v7 = vshrl.u32 %v288_v6, 7  ;;  %p787_p1 = pnand %p786_p11, %p1127_p10  ;;  %s791_s22 = scalar_lea.vmem %s790_s21, 4096 }
  0x5d   : > { %313 = vmatpush1.msra.mxu0 %v274_v11  ;;  %402 = vmatpush1.msra.mxu1 %v276_v12  ;;  %v263_v21 = vld [vmem:[#allocation5 + $0x148] sm:$0xff]  ;;  %v265_v22 = vld [vmem:[#allocation5 + $0x158] sm:$0xff]  ;;  %v262_v23 = vld [vmem:[#allocation5 + $0x140] sm:$0xff]  ;;  %p792_p6 = scmp.lt.s32.totalorder %s1061_s27, %s790_s21  ;;  %p793_p12 = scmp.lt.s32.totalorder %s791_s22, %s785_s9 }
  0x5e   : > { %314 = vmatprep.subr.mxu0 %v271_v13  ;;  %403 = vmatprep.subr.mxu1 %v273_v14  ;;  %v264_v24 = vld [vmem:[#allocation5 + $0x150] sm:$0xff]  ;;  %v259_v25 = vld [vmem:[#allocation5 + $0x128] sm:$0xff]  ;;  %v261_v26 = vld [vmem:[#allocation5 + $0x138] sm:$0xff]  ;;  %v290_v8 = vsub.s32 0, %v289_v7  ;;  %v298_v9 = vsub.s32 2, %v289_v7  ;;  %v294_v11 = vsub.s32 1, %v289_v7  ;;  %p788_p2 = pneg %p787_p1 }
  0x5f   : > { %315 = vmatpush1.msra.mxu0 %v270_v15  ;;  %404 = vmatpush1.msra.mxu1 %v272_v16  ;;  %v258_v27 = vld [vmem:[#allocation5 + $0x120] sm:$0xff]  ;;  %v260_v28 = vld [vmem:[#allocation5 + $0x130] sm:$0xff]  ;;  %v255_v29 = vld [vmem:[#allocation5 + $0x108] sm:$0xff]  ;;  %v302_v12 = vsub.s32 3, %v289_v7  ;;  %p794_p7 = por %p793_p12, %p792_p6 }
  0x60   : > { %316 = vmatprep.subr.mxu0 %v267_v17  ;;  %405 = vmatprep.subr.mxu1 %v269_v18  ;;  %v257_v30 = vld [vmem:[#allocation5 + $0x118] sm:$0xff]  ;;  %v254_v31 = vld [vmem:[#allocation5 + $0x100] sm:$0xff]  ;;  %v256_v32 = vld [vmem:[#allocation5 + $0x110] sm:$0xff] }
  0x61   : > { %317 = vmatpush1.msra.mxu0 %v266_v19  ;;  %406 = vmatpush1.msra.mxu1 %v268_v20  ;;  %v251_v33 = vld [vmem:[#allocation5 + $0xe8] sm:$0xff]  ;;  %v253_v34 = vld [vmem:[#allocation5 + $0xf8] sm:$0xff]  ;;  %v250_v35 = vld [vmem:[#allocation5 + $0xe0] sm:$0xff]  ;;  %p795_p9 = pnand %p794_p7, %p788_p2 }
  0x62   : > { %318 = vmatprep.subr.mxu0 %v263_v21  ;;  %407 = vmatprep.subr.mxu1 %v265_v22  ;;  %v252_v36 = vld [vmem:[#allocation5 + $0xf0] sm:$0xff]  ;;  %v247_v37 = vld [vmem:[#allocation5 + $0xc8] sm:$0xff]  ;;  %v249_v38 = vld [vmem:[#allocation5 + $0xd8] sm:$0xff] }
  0x63   : > { %319 = vmatpush1.msra.mxu0 %v262_v23  ;;  %408 = vmatpush1.msra.mxu1 %v264_v24  ;;  %v246_v39 = vld [vmem:[#allocation5 + $0xc0] sm:$0xff]  ;;  %v248_v40 = vld [vmem:[#allocation5 + $0xd0] sm:$0xff]  ;;  %v243_v41 = vld [vmem:[#allocation5 + $0xa8] sm:$0xff] }
  0x64   : > { %320 = vmatprep.subr.mxu0 %v259_v25  ;;  %409 = vmatprep.subr.mxu1 %v261_v26  ;;  %v245_v42 = vld [vmem:[#allocation5 + $0xb8] sm:$0xff]  ;;  %v242_v43 = vld [vmem:[#allocation5 + $0xa0] sm:$0xff]  ;;  %v244_v44 = vld [vmem:[#allocation5 + $0xb0] sm:$0xff] }
  0x65   : > { %321 = vmatpush1.msra.mxu0 %v258_v27  ;;  %410 = vmatpush1.msra.mxu1 %v260_v28  ;;  %v239_v45 = vld [vmem:[#allocation5 + $0x88] sm:$0xff]  ;;  %v241_v46 = vld [vmem:[#allocation5 + $0x98] sm:$0xff]  ;;  %v238_v47 = vld [vmem:[#allocation5 + $0x80] sm:$0xff] }
  0x66   : > { %322 = vmatprep.subr.mxu0 %v255_v29  ;;  %411 = vmatprep.subr.mxu1 %v257_v30  ;;  %v240_v48 = vld [vmem:[#allocation5 + $0x90] sm:$0xff]  ;;  %v235_v49 = vld [vmem:[#allocation5 + $0x68] sm:$0xff]  ;;  %v237_v50 = vld [vmem:[#allocation5 + $0x78] sm:$0xff] }
  0x67   : > { %323 = vmatpush1.msra.mxu0 %v254_v31  ;;  %412 = vmatpush1.msra.mxu1 %v256_v32  ;;  %v234_v51 = vld [vmem:[#allocation5 + $0x60] sm:$0xff]  ;;  %v236_v52 = vld [vmem:[#allocation5 + $0x70] sm:$0xff]  ;;  %v231_v53 = vld [vmem:[#allocation5 + $0x48] sm:$0xff] }
  0x68   : > { %324 = vmatprep.subr.mxu0 %v251_v33  ;;  %413 = vmatprep.subr.mxu1 %v253_v34  ;;  %v233_v54 = vld [vmem:[#allocation5 + $0x58] sm:$0xff]  ;;  %v230_v55 = vld [vmem:[#allocation5 + $0x40] sm:$0xff]  ;;  %v232_v56 = vld [vmem:[#allocation5 + $0x50] sm:$0xff] }
  0x69   : > { %325 = vmatpush1.msra.mxu0 %v250_v35  ;;  %414 = vmatpush1.msra.mxu1 %v252_v36  ;;  %v227_v57 = vld [vmem:[#allocation5 + $0x28] sm:$0xff]  ;;  %v229_v58 = vld [vmem:[#allocation5 + $0x38] sm:$0xff]  ;;  %v226_v59 = vld [vmem:[#allocation5 + $0x20] sm:$0xff] }
  0x6a   : > { %326 = vmatprep.subr.mxu0 %v247_v37  ;;  %415 = vmatprep.subr.mxu1 %v249_v38  ;;  %v228_v60 = vld [vmem:[#allocation5 + $0x30] sm:$0xff]  ;;  %v223_v61 = vld [vmem:[#allocation5 + $0x8] sm:$0xff]  ;;  %v225_v62 = vld [vmem:[#allocation5 + $0x18] sm:$0xff] }
  0x6b   : > { %327 = vmatpush1.msra.mxu0 %v246_v39  ;;  %416 = vmatpush1.msra.mxu1 %v248_v40  ;;  %v222_v63 = vld [vmem:[#allocation5] sm:$0xff]  ;;  %v224_v1 = vld [vmem:[#allocation5 + $0x10] sm:$0xff]  ;;  %v219_v3 = vld [vmem:[%s1017_s6 + $0x8] sm:$0xff] }
  0x6c   : > { %328 = vmatprep.subr.mxu0 %v243_v41  ;;  %417 = vmatprep.subr.mxu1 %v245_v42  ;;  %v218_v2 = vld [vmem:[%s1017_s6] sm:$0xff]  ;;  %v220_v4 = vld [vmem:[%s1017_s6 + $0x10] sm:$0xff]  ;;  %v221_v5 = vld [vmem:[%s1017_s6 + $0x18] sm:$0xff] }
  0x6d   : > { %329 = vmatpush1.msra.mxu0 %v242_v43  ;;  %418 = vmatpush1.msra.mxu1 %v244_v44  ;;  %v286_v10 = vld [vmem:[#allocation7] sm:$0xf] }
  0x6e   : > { %330 = vmatprep.subr.mxu0 %v239_v45  ;;  %419 = vmatprep.subr.mxu1 %v241_v46  ;;  %v291_v13 = vrot.slane %v286_v10, %v290_v8  ;;  %v299_v14 = vrot.slane %v286_v10, %v298_v9  ;;  %v295_v15 = vrot.slane %v286_v10, %v294_v11 }
  0x6f   : > { %331 = vmatpush1.msra.mxu0 %v238_v47  ;;  %420 = vmatpush1.msra.mxu1 %v240_v48  ;;  %v303_v16 = vrot.slane %v286_v10, %v302_v12 }
  0x70   : > { %332 = vmatprep.subr.mxu0 %v235_v49  ;;  %421 = vmatprep.subr.mxu1 %v237_v50 }
  0x71   : > { %333 = vmatpush1.msra.mxu0 %v234_v51  ;;  %422 = vmatpush1.msra.mxu1 %v236_v52 }
  0x72   : > { %334 = vmatprep.subr.mxu0 %v231_v53  ;;  %423 = vmatprep.subr.mxu1 %v233_v54 }
  0x73   : > { %335 = vmatpush1.msra.mxu0 %v230_v55  ;;  %424 = vmatpush1.msra.mxu1 %v232_v56 }
  0x74   : > { %336 = vmatprep.subr.mxu0 %v227_v57  ;;  %425 = vmatprep.subr.mxu1 %v229_v58 }
  0x75   : > { %337 = vmatpush1.msra.mxu0 %v226_v59  ;;  %426 = vmatpush1.msra.mxu1 %v228_v60 }
  0x76   : > { %338 = vmatprep.subr.mxu0 %v223_v61  ;;  %427 = vmatprep.subr.mxu1 %v225_v62 }
  0x77   : > { %339 = vmatpush1.msra.mxu0 %v222_v63  ;;  %428 = vmatpush1.msra.mxu1 %v224_v1 }
  0x78   : > { %373 = vmatmul.mubr.f32.vlgmr.msra.gmra.mxu0 %v218_v2  ;;  %462 = vmatmul.mubr.f32.vlgmr.msra.gmra.mxu1 %v218_v2 }
  0x79   : > { %378 = vmatprep.mubr.f32.mxu0 %v862_v0  ;;  %467 = vmatprep.mubr.f32.mxu1 %v862_v0 }
  0x7c   : > { %379 = vmatmul.mubr.f32.gmra.mxu0 %v219_v3  ;;  %468 = vmatmul.mubr.f32.gmra.mxu1 %v219_v3 }
  0x7d   : > { %384 = vmatprep.mubr.f32.mxu0 %v862_v0  ;;  %473 = vmatprep.mubr.f32.mxu1 %v862_v0 }
  0x80   : > { %385 = vmatmul.mubr.f32.gmra.mxu0 %v220_v4  ;;  %474 = vmatmul.mubr.f32.gmra.mxu1 %v220_v4 }
  0x81   : > { %390 = vmatprep.mubr.f32.mxu0 %v862_v0  ;;  %479 = vmatprep.mubr.f32.mxu1 %v862_v0 }
  0x84   : > { %391 = vmatmul.mubr.f32.gmra.mxu0 %v221_v5  ;;  %480 = vmatmul.mubr.f32.gmra.mxu1 %v221_v5 }
 0x138   : > { %v374_v17 = vpop.f32.mrf.mxu0  ;;  %v463_v18 = vpop.f32.mrf.mxu1 }
 0x139   : > { %v375_v19 = vadd.f32 %v374_v17, %v291_v13  ;;  %v464_v20 = vadd.f32 %v463_v18, %v299_v14 }
 0x13a   : > { %v376_v0 = vpop.f32.mrf.mxu0  ;;  %v465_v21 = vpop.f32.mrf.mxu1 }
 0x13b   : > { %486 = vst [vmem:[%s1040_s20] sm:$0xff] %v375_v19  ;;  %488 = vst [vmem:[%s1040_s20 + $0x10] sm:$0xff] %v464_v20  ;;  %v377_v22 = vadd.f32 %v376_v0, %v295_v15  ;;  %v466_v23 = vadd.f32 %v465_v21, %v303_v16 }
 0x13c   : > { %v380_v24 = vpop.f32.mrf.mxu0  ;;  %v469_v25 = vpop.f32.mrf.mxu1 }
 0x13d   : > { %487 = vst [vmem:[%s1040_s20 + $0x8] sm:$0xff] %v377_v22  ;;  %489 = vst [vmem:[%s1040_s20 + $0x18] sm:$0xff] %v466_v23  ;;  %v381_v26 = vadd.f32 %v380_v24, %v291_v13  ;;  %v470_v27 = vadd.f32 %v469_v25, %v299_v14 }
 0x13e   : > { %v382_v28 = vpop.f32.mrf.mxu0  ;;  %v471_v29 = vpop.f32.mrf.mxu1 }
 0x13f   : > { %490 = vst [vmem:[%s1040_s20 + $0x20] sm:$0xff] %v381_v26  ;;  %492 = vst [vmem:[%s1040_s20 + $0x30] sm:$0xff] %v470_v27  ;;  %v383_v30 = vadd.f32 %v382_v28, %v295_v15  ;;  %v472_v31 = vadd.f32 %v471_v29, %v303_v16 }
 0x140   : > { %v386_v32 = vpop.f32.mrf.mxu0  ;;  %v475_v33 = vpop.f32.mrf.mxu1 }
 0x141   : > { %491 = vst [vmem:[%s1040_s20 + $0x28] sm:$0xff] %v383_v30  ;;  %493 = vst [vmem:[%s1040_s20 + $0x38] sm:$0xff] %v472_v31  ;;  %v387_v34 = vadd.f32 %v386_v32, %v291_v13  ;;  %v476_v35 = vadd.f32 %v475_v33, %v299_v14 }
 0x142   : > { %v388_v36 = vpop.f32.mrf.mxu0  ;;  %v477_v37 = vpop.f32.mrf.mxu1 }
 0x143   : > { %494 = vst [vmem:[%s1040_s20 + $0x40] sm:$0xff] %v387_v34  ;;  %496 = vst [vmem:[%s1040_s20 + $0x50] sm:$0xff] %v476_v35  ;;  %v389_v38 = vadd.f32 %v388_v36, %v295_v15  ;;  %v478_v39 = vadd.f32 %v477_v37, %v303_v16 }
 0x144   : > { %v392_v40 = vpop.f32.mrf.mxu0  ;;  %v481_v41 = vpop.f32.mrf.mxu1 }
 0x145   : > { %495 = vst [vmem:[%s1040_s20 + $0x48] sm:$0xff] %v389_v38  ;;  %497 = vst [vmem:[%s1040_s20 + $0x58] sm:$0xff] %v478_v39  ;;  %v393_v42 = vadd.f32 %v392_v40, %v291_v13  ;;  %v482_v43 = vadd.f32 %v481_v41, %v299_v14 }
 0x146   : > { %v394_v44 = vpop.f32.mrf.mxu0  ;;  %v483_v45 = vpop.f32.mrf.mxu1 }
 0x147   : > { %498 = vst [vmem:[%s1040_s20 + $0x60] sm:$0xff] %v393_v42  ;;  %500 = vst [vmem:[%s1040_s20 + $0x70] sm:$0xff] %v482_v43  ;;  %v395_v46 = vadd.f32 %v394_v44, %v295_v15  ;;  %v484_v47 = vadd.f32 %v483_v45, %v303_v16 }
 0x149   : > { %499 = vst [vmem:[%s1040_s20 + $0x68] sm:$0xff] %v395_v46  ;;  %501 = vst [vmem:[%s1040_s20 + $0x78] sm:$0xff] %v484_v47 }
 0x14a   : > { %798 = shalt.err (!%p795_p9)
}
 0x14b   : > { %s799_s23 = scalar_lea.hbm %s1059_s8, 2048  ;;  %s803_s4 = scalar_lea.hbm %s1111_s3, 4096 }
 0x14c   : > { %p800_p13 = scmp.ne.s32.totalorder %s1059_s8, %s799_s23  ;;  %p804_p4 = scmp.lt.s32.totalorder %s1059_s8, %s1111_s3 }
 0x14d   : > { %p805_p8 = scmp.lt.s32.totalorder %s803_s4, %s799_s23 }
 0x14e   : > { %p801_p5 = pnand %p800_p13, %p1127_p10 }
 0x14f   : > { %p806_p3 = por %p805_p8, %p804_p4 }
 0x150   : > { %p802_p0 = pneg %p801_p5 }
 0x152   : > { %p807_p11 = pnand %p806_p3, %p802_p0 }
 0x154   : > { %810 = shalt.err (!%p807_p11)
}
 0x155   : > { %s864_s18 = smov 512   ;;  %s865_s20 = smov 32  }
 0x156   : > { %641 = dma.vmem_to_hbm [thread:$0]  (%p1127_p10), %s1061_s27, 2048, %s1059_s8, %s503_s16, %s864_s18, %s864_s18, %s865_s20  }
 0x157 PF: > { %s532_s25 = sand.u32 1, %s841_s12   ;;  %p1128_p1 = scmp.ne.s32.totalorder %s1117_s19, 0 }
 0x158   : > { %p1129_p2 = scmp.ge.s32.totalorder %s853_s15, 2  ;;  %s533_s28 = scalar_lea.sflag [#allocation4], %s532_s25 }
 0x15a   : > { %p655_p6 = pnand %p1129_p2, %p1128_p1 }
 0x15c   : > { %p656_p12 = pneg %p655_p6 }
 0x15e   : > { %836 = dma.done.wait (%p656_p12), %s533_s28, 2048  }
 0x15f   : > { %838 = vsyncadd (%p656_p12), %s533_s28, 4294965248  ;;  %p17_p7 = scmp.ge.s32.totalorder %s958_s7, 4   ;;  %s1130_s12 = smov %s845_s13 }
 0x160   : > { %s1131_s13 = smov %s849_s14  ;;  %s1132_s14 = smov %s974_s11 }
 0x161   : > { %s1133_s15 = smov %s958_s7  ;;  %19 = sbr.rel (!%p17_p7) target bundleno = 6 (0x6), region = 85 }
 0x166   :  { %538 = vsyncpa [#allocation3], 1 }
 0x167   :  { %540 = vsyncpa [#allocation3 + $0x1], 1 }
 0x168   :  { %541 = vsyncpa [#allocation6], 1 }
 0x169   :  { %542 = vsyncpa [#allocation4], 1 }
 0x16a   :  { %544 = vsyncpa [#allocation4 + $0x1], 1 }

</bundles_post_ra>
